<compile_context>
chip_gen: v7x
topology: tpu7x:2x2x1
jax: 0.10.0
libtpu: 0.0.40
codegen_flags: <defaults>
</compile_context>

<pallas_src>
import jax
import jax.numpy as jnp
import numpy as np
from jax.experimental import pallas as pl
from jax.experimental.pallas import tpu as pltpu


def layer_scale_kernel(x_ref, scale_ref, o_ref):
    # x_ref: (row_tile, dim), scale_ref: (1, dim) -> broadcast multiply.
    o_ref[...] = x_ref[...] * scale_ref[...]


def _pick_row_tile(rows, dim, itemsize, target_block_bytes=4 << 20):
    """Largest multiple-of-8 row count that divides `rows`, keeps one block under
    ~target_block_bytes of VMEM, and (when possible) leaves >= 2 grid steps so
    the parallel grid axis can use both TensorCores on v7x."""
    cap_rows = max(8, target_block_bytes // max(1, dim * itemsize))
    if rows >= 16:
        cap_rows = min(cap_rows, max(8, rows // 2))
    best = None
    t = 8
    while t <= rows:
        if rows % t == 0 and t <= cap_rows:
            best = t
        t += 8
    return best if best is not None else rows  # fall back: single full block


def layer_scale(x, scale):
    *lead, dim = x.shape
    assert scale.shape == (dim,), f"scale shape {scale.shape} != ({dim},)"
    rows = int(np.prod(lead)) if lead else 1

    x2 = x.reshape(rows, dim)
    scale2 = scale.astype(x.dtype).reshape(1, dim)  # 2-D lane-major parameter

    row_tile = _pick_row_tile(rows, dim, x2.dtype.itemsize)
    if rows % row_tile != 0:  # defensive; _pick_row_tile already guarantees this
        row_tile = rows
    grid = (rows // row_tile,)

    itemsize = x2.dtype.itemsize
    cost = pl.CostEstimate(
        flops=rows * dim,
        transcendentals=0,
        bytes_accessed=2 * rows * dim * itemsize + dim * itemsize,
    )

    # TODO(synk): the constant-index scale input could be single-buffered via
    # pipeline_mode=pl.Buffered(1); at dim*itemsize bytes it is negligible here.
    out2 = pl.pallas_call(
        layer_scale_kernel,
        out_shape=jax.ShapeDtypeStruct((rows, dim), x.dtype),
        grid_spec=pltpu.PrefetchScalarGridSpec(
            num_scalar_prefetch=0,
            grid=grid,
            in_specs=[
                pl.BlockSpec((row_tile, dim), lambda i: (i, 0)),  # x rows
                pl.BlockSpec((1, dim), lambda i: (0, 0)),         # scale (resident)
            ],
            out_specs=pl.BlockSpec((row_tile, dim), lambda i: (i, 0)),
        ),
        compiler_params=pltpu.CompilerParams(
            dimension_semantics=("parallel",),
        ),
        cost_estimate=cost,
    )(x2, scale2)

    return out2.reshape(x.shape)


def reference_layer_scale(x, scale):
    return x * scale  # broadcast over the last axis, same as the PyTorch module


if __name__ == "__main__":
    # x: (batch, seq, dim); scale: (dim,) — dim=128 keeps blocks lane-aligned.
    B, S, D = 2, 16, 128
    init_val = 0.01

    key = jax.random.PRNGKey(0)
    kx, ks = jax.random.split(key)
    x = jax.random.normal(kx, (B, S, D), dtype=jnp.float32)
    # nn.Parameter(torch.full([dim], init_val)); add a tiny per-channel
    # perturbation so the broadcast is verified channel-by-channel.
    scale = jnp.full((D,), init_val, jnp.float32) + 0.001 * jax.random.normal(
        ks, (D,), jnp.float32
    )

    out = layer_scale(x, scale)
    out = jax.block_until_ready(out)

    ref = reference_layer_scale(x, scale)
    np.testing.assert_allclose(np.asarray(out), np.asarray(ref), rtol=1e-6, atol=1e-6)

    print("KERNEL_OK")
</pallas_src>

<mosaic_0001>
module attributes {stable_mosaic.version = 11 : i64} {
  func.func @layer_scale_kernel(%arg0: i32, %arg1: memref<16x128xf32, #tpu.memory_space<vmem>>, %arg2: memref<1x128xf32, #tpu.memory_space<vmem>>, %arg3: memref<16x128xf32, #tpu.memory_space<vmem>>) attributes {dimension_semantics = [#tpu.dimension_semantics<parallel>], iteration_bounds = array<i64: 2>, scalar_prefetch = 0 : i64, scratch_operands = 0 : i64, tpu.core_type = #tpu.core_type<tc>, window_params = [{transform_indices = @transform_0, window_bounds = array<i64: 16, 128>}, {pipeline_mode = #tpu.pipeline_mode<synchronous>, transform_indices = @transform_1, window_bounds = array<i64: 1, 128>}, {transform_indices = @transform_2, window_bounds = array<i64: 16, 128>}]} {
    %c0 = arith.constant 0 : index
    %c0_0 = arith.constant 0 : index
    %0 = vector.load %arg1[%c0, %c0_0] : memref<16x128xf32, #tpu.memory_space<vmem>>, vector<16x128xf32>
    %c0_1 = arith.constant 0 : index
    %c0_2 = arith.constant 0 : index
    %1 = vector.load %arg2[%c0_1, %c0_2] : memref<1x128xf32, #tpu.memory_space<vmem>>, vector<1x128xf32>
    %2 = vector.broadcast %1 : vector<1x128xf32> to vector<16x128xf32>
    %3 = arith.mulf %0, %2 : vector<16x128xf32>
    %c0_3 = arith.constant 0 : index
    %c0_4 = arith.constant 0 : index
    %4 = vector.load %arg3[%c0_3, %c0_4] : memref<16x128xf32, #tpu.memory_space<vmem>>, vector<16x128xf32>
    tpu.vector_store %arg3[%c0_3, %c0_4], %3 {strides = array<i32>} : memref<16x128xf32, #tpu.memory_space<vmem>>, vector<16x128xf32>,
    return
  }
  func.func @transform_0(%arg0: i32) -> (i32, i32) {
    %c0_i32 = arith.constant 0 : i32
    %c0_i32_0 = arith.constant 0 : i32
    return %arg0, %c0_i32 : i32, i32
  }
  func.func @transform_1(%arg0: i32) -> (i32, i32) {
    %c0_i32 = arith.constant 0 : i32
    %c0_i32_0 = arith.constant 0 : i32
    %c0_i32_1 = arith.constant 0 : i32
    return %c0_i32, %c0_i32_0 : i32, i32
  }
  func.func @transform_2(%arg0: i32) -> (i32, i32) {
    %c0_i32 = arith.constant 0 : i32
    %c0_i32_0 = arith.constant 0 : i32
    return %arg0, %c0_i32 : i32, i32
  }
}

</mosaic_0001>

<bundles_post_ra>
// kernel: tpu_custom_call.1
= control target key start
LH: loop header
LB: loop body
LE: loop exit
PB: predicated region body
PF: predicated region fallthrough
CT: control target
= control target key end

     0   :  { %7 = vsyncpa [#allocation3], 0  ;;  %s615_s0 = inlined_call_operand.hbm [shape: f32[32,128], index: 0, kind: input, shape index: {}]   ;;  %s616_s1 = inlined_call_operand.vmem [shape: f32[1,128], index: 1, kind: input, shape index: {}]   ;;  %s617_s2 = inlined_call_operand.hbm [shape: f32[32,128], index: 2, kind: output, shape index: {}]  }
   0x1   :  { %9 = vsyncpa [#allocation3 + $0x1], 0 }
   0x2   :  { %10 = vsyncpa [#allocation4], 0 }
   0x3   :  { %12 = vsyncpa [#allocation4 + $0x1], 0  ;;  %s450_s9 = smov 0   ;;  %s452_s10 = smov 0  }
   0x4   :  { %s454_s11 = smov 0   ;;  %s456_s12 = smov 0  }
   0x5 LB: > { %s471_s13 = sadd.s32 4294967295, %s427_s12   ;;  %s264_s14 = sadd.s32 4294967294, %s427_s12   ;;  %s427_s12 = sphi %s456_s12, %s630_s12   ;;  %s423_s11 = sphi %s454_s11, %s629_s11   ;;  %s419_s10 = sphi %s452_s10, %s628_s10   ;;  %s415_s9 = sphi %s450_s9, %s627_s9  }
   0x6   : > { %s475_s15 = sadd.s32 1, %s427_s12   ;;  %s25_s16 = sadd.s32 1, %s423_s11 }
   0x7   : > { %s22_s17 = ssub.s32 %s427_s12, %s475_s15  ;;  %p32_p0 = scmp.ne.s32.totalorder %s423_s11, %s419_s10 }
   0x8   : > { %p23_p1 = scmp.eq.s32.totalorder %s22_s17, 0  ;;  %p33_p2 = scmp.eq.s32.totalorder %s427_s12, 0 }
   0x9   : > { %p38_p3 = scmp.ne.s32.totalorder %s419_s10, %s415_s9  ;;  %p39_p4 = scmp.eq.s32.totalorder %s471_s13, 0 }
   0xa   : > { %s487_s18 = scalar_select %p23_p1, %s423_s11, %s25_s16  }
   0xb   : > { %p489_p5 = por %p33_p2, %p32_p0  ;;  %p493_p6 = por %p39_p4, %p38_p3 }
   0xc   : > { %p83_p7 = scmp.eq.s32.totalorder %s471_s13, 1  ;;  %p89_p8 = scmp.eq.s32.totalorder %s264_s14, 1 }
   0xd   : > { %p293_p10 = scmp.lt.s32.totalorder %s427_s12, 2  ;;  %s112_s23 = sand.u32 1, %s423_s11  }
   0xe   : > { %p500_p11 = por %p83_p7, %p32_p0  ;;  %p504_p12 = por %p89_p8, %p38_p3 }
   0xf   : > { %s279_s24 = sshll.u32 %s427_s12, 8  ;;  %s267_s25 = sshll.u32 %s112_s23, 4 }
  0x10   : > { %s621_s21 = scalar_select %p500_p11, 1, 0 }
  0x11   : > { %s622_s22 = scalar_select %p504_p12, 1, 0 }
  0x12   : > { %s513_s28 = scalar_lea.hbm %s615_s0, %s279_s24  ;;  %s116_s29 = scalar_lea.vmem [#allocation2], %s267_s25 }
  0x13   : > { %s123_s30 = sshll.u32 %s116_s29, 4  ;;  %p517_p13 = pnand %p293_p10, %p489_p5  ;;  %s521_s30 = int_to_ptr.vmem [resolvable:$true] %s123_s30 }
  0x14   : > { %s523_s4 = scalar_lea.sflag [#allocation3], %s112_s23  ;;  %s331_s5 = scalar_lea.hbm %s513_s28, 256 }
  0x15   : > { %p332_p0 = scmp.ne.s32.totalorder %s513_s28, %s331_s5  ;;  %p333_p1 = pneg %p517_p13 }
  0x16   : > { %s336_s8 = scalar_lea.hbm %s615_s0, 512  ;;  %p337_p4 = scmp.lt.u32.totalorder %s513_s28, %s615_s0 }
  0x17   : > { %p334_p2 = pnand %p333_p1, %p332_p0  ;;  %p338_p5 = scmp.lt.u32.totalorder %s336_s8, %s331_s5 }
  0x18   : > { %p340_p8 = scmp.lt.u32.totalorder %s331_s5, %s513_s28 }
  0x19   : > { %p335_p3 = pneg %p334_p2  ;;  %p339_p7 = por %p338_p5, %p337_p4 }
  0x1b   : > { %p341_p10 = por %p340_p8, %p339_p7 }
  0x1d   : > { %p342_p9 = pnand %p341_p10, %p335_p3 }
  0x1f   : > { %345 = shalt.err (!%p342_p9)
}
  0x20   : > { %s346_s17 = scalar_lea.vmem %s521_s30, 256  ;;  %s429_s19 = smov [#allocation2]  }
  0x21   : > { %p347_p0 = scmp.ne.s32.totalorder %s521_s30, %s346_s17  ;;  %s351_s23 = sshll.u32 %s429_s19, 4  ;;  %s352_s23 = int_to_ptr.vmem [resolvable:$false] %s351_s23 }
  0x22   : > { %s353_s24 = scalar_lea.vmem %s352_s23, 512  ;;  %p354_p11 = scmp.lt.s32.totalorder %s521_s30, %s352_s23 }
  0x23   : > { %p349_p2 = pnand %p347_p0, %p333_p1  ;;  %p355_p4 = scmp.lt.s32.totalorder %s353_s24, %s346_s17 }
  0x25   : > { %p350_p12 = pneg %p349_p2  ;;  %p356_p5 = por %p355_p4, %p354_p11 }
  0x27   : > { %p357_p7 = pnand %p356_p5, %p350_p12 }
  0x29   : > { %360 = shalt.err (!%p357_p7)
}
  0x2a   : > { %s430_s25 = smov 128   ;;  %s431_s26 = smov 8  }
  0x2b   : > { %288 = dma.hbm_to_vmem [thread:$0]  (!%p517_p13), %s513_s28, 256, %s521_s30, %s523_s4, %s430_s25, %s430_s25, %s431_s26  }
  0x2c   : > { %p270_p9 = scmp.ge.s32.totalorder %s427_s12, 1  ;;  %p131_p1 = scmp.lt.s32.totalorder %s427_s12, 3 }
  0x2e   : > { %p132_p3 = pnand %p270_p9, %p131_p1 }
  0x2f   : > { %s554_s27 = sand.u32 (!%p132_p3), 1, %s419_s10  }
  0x30   : > { %135 = sbr.rel (%p132_p3) target bundleno = 83 (0x53), region = 28  ;;  %s271_s29 = sshll.u32 (!%p132_p3), %s554_s27, 4 }
  0x31   : > { %s138_s5 = scalar_lea.sflag (!%p132_p3), [#allocation3], %s554_s27  ;;  %s141_s6 = scalar_lea.vmem (!%p132_p3), [#allocation2], %s271_s29 }
  0x37   : > { %406 = dma.done.wait (%p493_p6), %s138_s5, 256  }
  0x38   : > { %408 = vsyncadd (%p493_p6), %s138_s5, 4294967040  ;;  %s161_s28 = scalar_lea.vmem [#allocation5], %s271_s29  ;;  %s280_s3 = sshll.u32 %s471_s13, 8  ;;  %v164_v0 = vld [vmem:[%s141_s6] sm:$0xff]  ;;  %v165_v2 = vld [vmem:[%s141_s6 + $0x8] sm:$0xff] }
  0x39   : > { %s191_s30 = sshll.u32 %s161_s28, 4  ;;  %v273_v1 = vld [vmem:[%s616_s1] ss:$0 sm:$0xff]  ;;  %s571_s14 = scalar_lea.hbm %s617_s2, %s280_s3  ;;  %s566_s30 = int_to_ptr.vmem [resolvable:$true] %s191_s30 }
  0x3a   : > { %v173_v3 = vmul.f32 %v273_v1, %v164_v0  ;;  %v174_v4 = vmul.f32 %v273_v1, %v165_v2  ;;  %s178_s13 = scalar_lea.sflag [#allocation4], %s554_s27  ;;  %s361_s16 = scalar_lea.vmem %s566_s30, 256 }
  0x3b   : > { %p362_p6 = scmp.ne.s32.totalorder %s566_s30, %s361_s16  ;;  %p624_p11 = scmp.ne.s32.totalorder %s621_s21, 0 }
  0x3c   : > { %175 = vst [vmem:[%s161_s28] sm:$0xff] %v173_v3  ;;  %176 = vst [vmem:[%s161_s28 + $0x8] sm:$0xff] %v174_v4  ;;  %s432_s17 = smov [#allocation5]  }
  0x3d   : > { %p363_p12 = pnand %p362_p6, %p624_p11  ;;  %s365_s19 = sshll.u32 %s432_s17, 4  ;;  %s366_s19 = int_to_ptr.vmem [resolvable:$false] %s365_s19 }
  0x3e   : > { %s367_s23 = scalar_lea.vmem %s366_s19, 512  ;;  %p368_p8 = scmp.lt.s32.totalorder %s566_s30, %s366_s19 }
  0x3f   : > { %p364_p13 = pneg %p363_p12  ;;  %p369_p10 = scmp.lt.s32.totalorder %s367_s23, %s361_s16 }
  0x41   : > { %p370_p0 = por %p369_p10, %p368_p8 }
  0x43   : > { %p371_p2 = pnand %p370_p0, %p364_p13 }
  0x45   : > { %374 = shalt.err (!%p371_p2)
}
  0x46   : > { %s375_s24 = scalar_lea.hbm %s571_s14, 256  ;;  %s379_s29 = scalar_lea.hbm %s617_s2, 512 }
  0x47   : > { %p376_p4 = scmp.ne.s32.totalorder %s571_s14, %s375_s24  ;;  %p380_p9 = scmp.lt.u32.totalorder %s571_s14, %s617_s2 }
  0x48   : > { %p381_p1 = scmp.lt.u32.totalorder %s379_s29, %s375_s24  ;;  %p383_p6 = scmp.lt.u32.totalorder %s375_s24, %s571_s14 }
  0x49   : > { %p377_p5 = pnand %p376_p4, %p624_p11 }
  0x4a   : > { %p382_p3 = por %p381_p1, %p380_p9 }
  0x4b   : > { %p378_p7 = pneg %p377_p5 }
  0x4c   : > { %p384_p12 = por %p383_p6, %p382_p3 }
  0x4e   : > { %p385_p13 = pnand %p384_p12, %p378_p7 }
  0x50   : > { %388 = shalt.err (!%p385_p13)
}
  0x51   : > { %s433_s28 = smov 128   ;;  %s434_s3 = smov 8  }
  0x52   : > { %283 = dma.vmem_to_hbm [thread:$0]  (%p624_p11), %s566_s30, 256, %s571_s14, %s178_s13, %s433_s28, %s433_s28, %s434_s3  }
  0x53 PF: > { %s206_s4 = sand.u32 1, %s415_s9   ;;  %p625_p8 = scmp.ne.s32.totalorder %s622_s22, 0 }
  0x54   : > { %p626_p10 = scmp.ge.s32.totalorder %s427_s12, 2  ;;  %s207_s7 = scalar_lea.sflag [#allocation4], %s206_s4 }
  0x56   : > { %p290_p0 = pnand %p626_p10, %p625_p8 }
  0x58   : > { %410 = dma.done.wait (!%p290_p0), %s207_s7, 256  }
  0x59   : > { %412 = vsyncadd (!%p290_p0), %s207_s7, 4294967040  ;;  %p15_p2 = scmp.ge.s32.totalorder %s475_s15, 4   ;;  %s627_s9 = smov %s419_s10 }
  0x5a   : > { %s628_s10 = smov %s423_s11  ;;  %s629_s11 = smov %s487_s18 }
  0x5b   : > { %s630_s12 = smov %s475_s15  ;;  %17 = sbr.rel (!%p15_p2) target bundleno = 5 (0x5), region = 73 }
  0x62   :  { %212 = vsyncpa [#allocation3], 1 }
  0x63   :  { %214 = vsyncpa [#allocation3 + $0x1], 1 }
  0x64   :  { %215 = vsyncpa [#allocation4], 1 }
  0x65   :  { %217 = vsyncpa [#allocation4 + $0x1], 1 }

</bundles_post_ra>
